<compile_context>
chip_gen: v7x
topology: tpu7x:2x2x1
jax: 0.10.0
libtpu: 0.0.40
codegen_flags: <defaults>
</compile_context>

<pallas_src>
import functools

import jax
import jax.numpy as jnp
from jax import lax
from jax.experimental import pallas as pl
from jax.experimental.pallas import tpu as pltpu


def _bap_gap_kernel(f_ref, a_ref, o_ref, *, inv_hw):
    # f_ref: (Tc, HW), a_ref: (M, HW), o_ref: (M, Tc)
    # GAP(features * attention_m) == (A contracted-with F over HW) / HW.
    # Trans-RHS contraction -> no explicit transpose / XLU shuffle; Mosaic
    # zero-masks the ragged HW tail (HW block == full array dim).
    prod = lax.dot_general(
        a_ref[...], f_ref[...],
        dimension_numbers=(((1,), (1,)), ((), ())),
        preferred_element_type=jnp.float32,
    )  # (M, Tc), accumulated in f32 on the MXU
    o_ref[...] = (prod * inv_hw).astype(o_ref.dtype)


def _bap_gmp_kernel(f_ref, a_ref, o_ref):
    # Global-max-pool variant: out[m, c] = max_hw(a[m, hw] * f[c, hw]).
    # Stream over attention rows (never materialize an (M, Tc, HW) product);
    # rows are handled in sublane groups of 8 so each group is a single
    # lane/sublane-dense (8, Tc) store instead of 8 masked 1-sublane stores.
    f = f_ref[...]                       # (Tc, HW), kept in input dtype
    m_total = a_ref.shape[0]
    grp = 8

    def rows_max(base, count):
        rows = []
        for j in range(count):
            a_m = a_ref[pl.ds(base + j, 1), :]          # (1, HW)
            rows.append(jnp.max(a_m * f, axis=-1))      # (Tc,)  XLU reduce
        return jnp.stack(rows, axis=0)                  # (count, Tc)

    n_grp = m_total // grp
    if n_grp > 0:
        def body(g, carry):
            base = pl.multiple_of(g * grp, grp)
            o_ref[pl.ds(base, grp), :] = rows_max(base, grp).astype(o_ref.dtype)
            return carry
        lax.fori_loop(0, n_grp, body, 0, unroll=False)

    rem = m_total % grp
    if rem:
        base = n_grp * grp
        o_ref[pl.ds(base, rem), :] = rows_max(base, rem).astype(o_ref.dtype)


def _vmem_budget_bytes():
    cap = 64 << 20  # conservative default: v7x physical VMEM per TensorCore
    try:
        cap = int(pltpu.get_tpu_info().vmem_capacity_bytes)
    except Exception:
        pass
    # Never plan beyond 64 MiB (smallest physical VMEM across v5e/v6e/v7x) and
    # keep headroom for compiler temps / double-buffer bookkeeping.
    return (min(cap, 64 << 20) * 3) // 4


def _tile_footprint_bytes(tc, M, HW, itemsize, pool):
    by = 2 * tc * HW * itemsize      # F tile, double-buffered
    by += 2 * M * HW * itemsize      # A tile, double-buffered (reused across c)
    by += 2 * M * tc * itemsize      # output tile, double-buffered
    if pool == "GMP":
        by += tc * HW * 4            # live per-row product (f32 worst case)
    else:
        by += M * tc * 4             # f32 dot accumulator
    return by


def _pick_c_tile(C, M, HW, itemsize, B, pool):
    """Largest lane-aligned C tile that fits the VMEM budget, with enough grid
    steps to occupy both v7x TensorCores.  Falls back to full C when C is not a
    lane multiple (block dim == full array dim is always legal)."""
    budget = _vmem_budget_bytes()
    if C % 128 != 0:
        # TODO(synk): for very large C*HW with non-lane-aligned C, add an HW
        # grid axis ("arbitrary") with a VMEM accumulator instead of full C.
        return C, _tile_footprint_bytes(C, M, HW, itemsize, pool)

    cands = [t for t in range(128, C + 1, 128) if C % t == 0]
    fitting = [t for t in cands
               if _tile_footprint_bytes(t, M, HW, itemsize, pool) <= budget]
    if not fitting:
        fitting = [128]
    tc = max(fitting)
    # Megacore occupancy: keep at least 4 grid steps (2 TCs x 2) when possible.
    while tc > 128 and B * (C // tc) < 4:
        smaller = [t for t in fitting if t < tc]
        if not smaller:
            break
        tc = max(smaller)
    return tc, _tile_footprint_bytes(tc, M, HW, itemsize, pool)


def bap(features, attentions, pool="GAP"):
    """features: (B, C, H, W), attentions: (B, M, H, W) -> (B, M, C)."""
    assert pool in ("GAP", "GMP")
    B, C, H, W = features.shape
    Ba, M, Ha, Wa = attentions.shape
    assert B == Ba and H == Ha and W == Wa
    HW = H * W
    itemsize = jnp.dtype(features.dtype).itemsize

    # Spatially flatten only -- no padding, no extra HBM traffic.
    f_flat = features.reshape(B, C, HW)
    a_flat = attentions.reshape(B, M, HW)

    Tc, footprint = _pick_c_tile(C, M, HW, itemsize, B, pool)
    grid = (B, C // Tc)

    if pool == "GAP":
        kernel = functools.partial(_bap_gap_kernel, inv_hw=1.0 / HW)
    else:
        kernel = _bap_gmp_kernel

    cost = pl.CostEstimate(
        flops=2 * B * M * C * HW,
        transcendentals=0,
        bytes_accessed=itemsize * B * (C * HW + M * HW + M * C),
    )

    # >= footprint (+margin), >= 32 MiB (beats v5e's 16 MiB scoped default),
    # <= 64 MiB (v7x physical VMEM).
    vmem_limit = int(min(64 << 20, max(32 << 20, footprint + (8 << 20))))

    out = pl.pallas_call(
        kernel,
        out_shape=jax.ShapeDtypeStruct((B, M, C), features.dtype),
        grid_spec=pltpu.PrefetchScalarGridSpec(
            num_scalar_prefetch=0,
            grid=grid,
            in_specs=[
                # leading size-1 batch dim squeezed -> kernel refs are 2-D;
                # the HW block equals the full (possibly ragged) array dim.
                pl.BlockSpec((None, Tc, HW), lambda b, c: (b, c, 0)),
                # A block index constant across c -> DMA'd once per batch step.
                pl.BlockSpec((None, M, HW), lambda b, c: (b, 0, 0)),
            ],
            out_specs=pl.BlockSpec((None, M, Tc), lambda b, c: (b, 0, c)),
        ),
        compiler_params=pltpu.CompilerParams(
            dimension_semantics=("parallel", "parallel"),
            vmem_limit_bytes=vmem_limit,
        ),
        cost_estimate=cost,
    )(f_flat, a_flat)
    return out


def bap_reference(features, attentions, pool="GAP"):
    # Pure-JAX reference matching the PyTorch loop exactly.
    B, C, H, W = features.shape
    M = attentions.shape[1]
    outs = []
    for i in range(M):
        prod = features * attentions[:, i : i + 1, :, :]  # (B, C, H, W)
        if pool == "GAP":
            pooled = jnp.mean(prod, axis=(2, 3))
        else:
            pooled = jnp.max(prod, axis=(2, 3))
        outs.append(pooled.reshape(B, 1, C))
    return jnp.concatenate(outs, axis=1)                   # (B, M, C)


def _check(features, attentions, pool, atol, rtol):
    out = jax.block_until_ready(bap(features, attentions, pool=pool))
    ref = bap_reference(features, attentions, pool=pool)
    assert out.shape == ref.shape, (out.shape, ref.shape)
    err = float(jnp.max(jnp.abs(out - ref)))
    assert jnp.allclose(out, ref, atol=atol, rtol=rtol), (pool, err)


if __name__ == "__main__":
    key = jax.random.PRNGKey(0)
    k1, k2, k3, k4 = jax.random.split(key, 4)

    # Main case: WS-DAN-like 14x14 maps (HW=196 is NOT a lane multiple, so this
    # exercises the no-pad ragged-lane path), lane-aligned C (tiled), and M=12
    # so GMP covers both the dense 8-row-group store and the tail store.
    B, C, H, W, M = 2, 256, 14, 14, 12
    features = jax.random.normal(k1, (B, C, H, W), dtype=jnp.float32)
    attentions = jax.random.normal(k2, (B, M, H, W), dtype=jnp.float32)
    _check(features, attentions, "GAP", atol=1e-4, rtol=1e-4)
    _check(features, attentions, "GMP", atol=1e-5, rtol=1e-5)

    # Small non-lane-aligned-C case: exercises the full-C (Tc == C) fallback.
    B2, C2, H2, W2, M2 = 2, 48, 16, 16, 4
    features2 = jax.random.normal(k3, (B2, C2, H2, W2), dtype=jnp.float32)
    attentions2 = jax.random.normal(k4, (B2, M2, H2, W2), dtype=jnp.float32)
    _check(features2, attentions2, "GAP", atol=1e-4, rtol=1e-4)
    _check(features2, attentions2, "GMP", atol=1e-5, rtol=1e-5)

    print("KERNEL_OK")
</pallas_src>

<mosaic_0001>
module attributes {stable_mosaic.version = 11 : i64} {
  func.func @_bap_gap_kernel(%arg0: i32, %arg1: i32, %arg2: memref<1x128x196xf32, #tpu.memory_space<vmem>>, %arg3: memref<1x12x196xf32, #tpu.memory_space<vmem>>, %arg4: memref<1x12x128xf32, #tpu.memory_space<vmem>>) attributes {dimension_semantics = [#tpu.dimension_semantics<parallel>, #tpu.dimension_semantics<parallel>], iteration_bounds = array<i64: 2, 2>, scalar_prefetch = 0 : i64, scratch_operands = 0 : i64, tpu.core_type = #tpu.core_type<tc>, window_params = [{transform_indices = @transform_0, window_bounds = array<i64: 1, 128, 196>}, {transform_indices = @transform_1, window_bounds = array<i64: 1, 12, 196>}, {transform_indices = @transform_2, window_bounds = array<i64: 1, 12, 128>}]} {
    %c0 = arith.constant 0 : index
    %c0_0 = arith.constant 0 : index
    %c0_1 = arith.constant 0 : index
    %0 = vector.load %arg3[%c0, %c0_0, %c0_1] : memref<1x12x196xf32, #tpu.memory_space<vmem>>, vector<1x12x196xf32>
    %1 = vector.shape_cast %0 : vector<1x12x196xf32> to vector<12x196xf32>
    %c0_2 = arith.constant 0 : index
    %c0_3 = arith.constant 0 : index
    %c0_4 = arith.constant 0 : index
    %2 = vector.load %arg2[%c0_2, %c0_3, %c0_4] : memref<1x128x196xf32, #tpu.memory_space<vmem>>, vector<1x128x196xf32>
    %3 = vector.shape_cast %2 : vector<1x128x196xf32> to vector<128x196xf32>
    %cst = arith.constant dense<0.000000e+00> : vector<12x128xf32>
    %4 = tpu.matmul %1, %3, %cst {dimension_numbers = #tpu.dot_dimension_numbers<[1], [1], [0], [0], [0, 0, 1, 0], [], []>} : vector<12x196xf32>, vector<128x196xf32>, vector<12x128xf32> -> vector<12x128xf32>
    %cst_5 = arith.constant 0.00510204071 : f32
    %5 = vector.broadcast %cst_5 : f32 to vector<12x128xf32>
    %6 = arith.mulf %4, %5 : vector<12x128xf32>
    %c0_6 = arith.constant 0 : index
    %c0_7 = arith.constant 0 : index
    %c0_8 = arith.constant 0 : index
    %7 = vector.load %arg4[%c0_6, %c0_7, %c0_8] : memref<1x12x128xf32, #tpu.memory_space<vmem>>, vector<1x12x128xf32>
    %8 = vector.shape_cast %7 : vector<1x12x128xf32> to vector<12x128xf32>
    %9 = vector.shape_cast %6 : vector<12x128xf32> to vector<1x12x128xf32>
    tpu.vector_store %arg4[%c0_6, %c0_7, %c0_8], %9 {strides = array<i32>} : memref<1x12x128xf32, #tpu.memory_space<vmem>>, vector<1x12x128xf32>,
    return
  }
  func.func @transform_0(%arg0: i32, %arg1: i32) -> (i32, i32, i32) {
    %c0_i32 = arith.constant 0 : i32
    %c0_i32_0 = arith.constant 0 : i32
    return %arg0, %arg1, %c0_i32 : i32, i32, i32
  }
  func.func @transform_1(%arg0: i32, %arg1: i32) -> (i32, i32, i32) {
    %c0_i32 = arith.constant 0 : i32
    %c0_i32_0 = arith.constant 0 : i32
    %c0_i32_1 = arith.constant 0 : i32
    return %arg0, %c0_i32, %c0_i32_0 : i32, i32, i32
  }
  func.func @transform_2(%arg0: i32, %arg1: i32) -> (i32, i32, i32) {
    %c0_i32 = arith.constant 0 : i32
    %c0_i32_0 = arith.constant 0 : i32
    return %arg0, %c0_i32, %arg1 : i32, i32, i32
  }
}

</mosaic_0001>

<bundles_post_ra>
// kernel: tpu_custom_call.1
= control target key start
LH: loop header
LB: loop body
LE: loop exit
PB: predicated region body
PF: predicated region fallthrough
CT: control target
= control target key end

     0   :  { %s712_s9 = smov 0   ;;  %s714_s10 = smov 0   ;;  %s885_s0 = inlined_call_operand.vmem [shape: f32[2,256,196], index: 0, kind: input, shape index: {}]   ;;  %s886_s1 = inlined_call_operand.vmem [shape: f32[2,12,196], index: 1, kind: input, shape index: {}]   ;;  %s887_s2 = inlined_call_operand.vmem [shape: f32[2,12,256], index: 2, kind: output, shape index: {}]  }
   0x1   :  { %s716_s11 = smov 0   ;;  %s718_s12 = smov 0  }
   0x2   :  { %s720_s13 = smov 0   ;;  %s722_s14 = smov 0  }
   0x3   :  { %s724_s15 = smov 0  }
   0x4 LB: > { %s21_s16 = sadd.s32 1, %s687_s13  ;;  %s24_s17 = sadd.s32 1, %s691_s14  ;;  %s695_s15 = sphi %s724_s15, %s12_s15   ;;  %s691_s14 = sphi %s722_s14, %s896_s14   ;;  %s687_s13 = sphi %s720_s13, %s895_s13   ;;  %s683_s12 = sphi %s718_s12, %s894_s12   ;;  %s679_s11 = sphi %s716_s11, %s893_s11   ;;  %s675_s10 = sphi %s714_s10, %s892_s10   ;;  %s671_s9 = sphi %s712_s9, %s891_s9  }
   0x5   : > { %p22_p0 = scmp.ge.s32.totalorder %s21_s16, 2  ;;  %s493_s18 = sadd.s32 4294967295, %s695_s15  }
   0x6   : > { %p97_p1 = scmp.ne.s32.totalorder %s675_s10, %s671_s9  ;;  %p98_p2 = scmp.eq.s32.totalorder %s493_s18, 3 }
   0x7   : > { %s898_s16 = smov (%p22_p0, %s21_s16), 0  ;;  %s900_s17 = smov (!%p22_p0, %s24_s17), %s691_s14 }
   0x8   : > { %s83_s19 = ssub.s32 %s687_s13, %s898_s16  ;;  %p26_p3 = scmp.ge.s32.totalorder %s900_s17, 2 }
   0x9   : > { %p497_p4 = scmp.ge.s32.totalorder %s695_s15, 1  ;;  %p758_p5 = por %p98_p2, %p97_p1 }
   0xa   : > { %p144_p6 = scmp.lt.s32.totalorder %s695_s15, 5  ;;  %s902_s17 = smov (%p26_p3, %s900_s17), 0 }
   0xb   : > { %s82_s21 = ssub.s32 %s691_s14, %s902_s17  ;;  %s87_s23 = sadd.s32 1, %s675_s10 }
   0xc   : > { %p145_p7 = pnand %p497_p4, %p144_p6  ;;  %s84_s22 = sor.u32 %s83_s19, %s82_s21 }
   0xd   : > { %p85_p8 = scmp.eq.s32.totalorder %s84_s22, 0  ;;  %s499_s25 = sshll.u32 (!%p145_p7), %s679_s11, 4  ;;  %vm227_vm0 = vcmask (!%p145_p7), 556032  }
   0xe   : > { %148 = sbr.rel (%p145_p7) target bundleno = 318 (0x13e), region = 28  ;;  %p176_p9 = scmp.lt.s32.totalorder (!%p145_p7), %s683_s12, 1  ;;  %vm786_vm1 = vmpackc.low (!%p145_p7), %vm227_vm0, %vm227_vm0 }
   0xf   : > { %s769_s24 = scalar_select %p85_p8, %s675_s10, %s87_s23  }
  0x10   : > { %p178_p10 = scmp.lt.s32.totalorder (!%p145_p7), %s499_s25, 31  ;;  %s172_s19 = sand.u32 (!%p145_p7), 1, %s671_s9  }
  0x11   : > { %s498_s21 = sshll.u32 (!%p145_p7), %s172_s19, 4 }
  0x12   : > { %s174_s22 = scalar_lea.vmem (!%p145_p7), [#allocation2], %s498_s21 }
  0x15   : > { %s177_s26 = scalar_select %p176_p9, %s683_s12, 1 }
  0x16   : > { %s904_s25 = smov (!%p178_p10, %s499_s25), 31  ;;  %s524_s23 = sshll.u32 (%p758_p5), %s683_s12, 2 }
  0x17   : > { %s501_s27 = sshll.u32 %s177_s26, 6  ;;  %s528_s28 = sshll.u32 %s177_s26, 5 }
  0x18   : > { %s500_s29 = sshll.u32 %s904_s25, 1  ;;  %s777_s4 = scalar_lea.vmem %s886_s1, %s528_s28 }
  0x19   : > { %s182_s5 = sadd.s32 %s501_s27, %s500_s29  ;;  %v192_v0 = vld [vmem:[%s777_s4 + $0x8] sm:$0xff]  ;;  %v194_v1 = vld [vmem:[%s777_s4 + $0x18] sm:$0xf]  ;;  %v191_v51 = vld [vmem:[%s777_s4] sm:$0xff]  ;;  %s369_s25 = sadd.s32 (%p758_p5), %s679_s11, %s524_s23 }
  0x1a   : > { %s502_s6 = sshll.u32 %s182_s5, 3  ;;  %521 = vmatprep.mubr.msk.f32.mxu0 %vm227_vm0, %v192_v0  ;;  %522 = vmatprep.mubr.msk.f32.mxu1 %vm227_vm0, %v194_v1  ;;  %v193_v52 = vld [vmem:[%s777_s4 + $0x10] sm:$0xf]  ;;  %s525_s9 = sshll.u32 (%p758_p5), %s369_s25, 3 }
  0x1b   : > { %s784_s18 = scalar_lea.vmem %s885_s0, %s502_s6  ;;  %s371_s28 = scalar_lea.vmem (%p758_p5), %s887_s2, %s525_s9 }
  0x1c   : > { %v196_v3 = vld [vmem:[%s784_s18 + $0x8] sm:$0xff]  ;;  %v198_v4 = vld [vmem:[%s784_s18 + $0x18] sm:$0xff]  ;;  %v195_v5 = vld [vmem:[%s784_s18] sm:$0xff] }
  0x1d   : > { %v529_v6 = vpack.c.bf16 %v198_v4, %v196_v3  ;;  %v197_v7 = vld [vmem:[%s784_s18 + $0x10] sm:$0xff]  ;;  %v200_v8 = vld [vmem:[%s784_s18 + $0x28] sm:$0xff]  ;;  %v202_v9 = vld [vmem:[%s784_s18 + $0x38] sm:$0xff] }
  0x1e   : > { %v532_v10 = vpack.c.bf16 %v197_v7, %v195_v5  ;;  %v534_v11 = vpack.c.bf16 %v202_v9, %v200_v8  ;;  %v199_v12 = vld [vmem:[%s784_s18 + $0x20] sm:$0xff]  ;;  %v201_v13 = vld [vmem:[%s784_s18 + $0x30] sm:$0xff]  ;;  %v204_v14 = vld [vmem:[%s784_s18 + $0x48] sm:$0xff] }
  0x1f   : > { %531 = vmatprep.subr.msk.bf16.mxu0 %vm786_vm1, %v529_v6  ;;  %569 = vmatprep.subr.msk.bf16.mxu1 %vm786_vm1, %v529_v6  ;;  %v206_v15 = vld [vmem:[%s784_s18 + $0x58] sm:$0xff]  ;;  %v537_v16 = vpack.c.bf16 %v201_v13, %v199_v12  ;;  %v203_v18 = vld [vmem:[%s784_s18 + $0x40] sm:$0xff]  ;;  %v205_v19 = vld [vmem:[%s784_s18 + $0x50] sm:$0xff] }
  0x20   : > { %533 = vmatpush1.bf16.xpose.msra.mxu0 %v532_v10  ;;  %577 = vmatpush1.bf16.xpose.msra.mxu1 %v532_v10  ;;  %v539_v17 = vpack.c.bf16 %v206_v15, %v204_v14  ;;  %v208_v20 = vld [vmem:[%s784_s18 + $0x68] sm:$0xff]  ;;  %v210_v21 = vld [vmem:[%s784_s18 + $0x78] sm:$0xff]  ;;  %v542_v22 = vpack.c.bf16 %v205_v19, %v203_v18  ;;  %v207_v24 = vld [vmem:[%s784_s18 + $0x60] sm:$0xff] }
  0x21   : > { %536 = vmatprep.subr.msk.bf16.mxu0 %vm786_vm1, %v534_v11  ;;  %570 = vmatprep.subr.msk.bf16.mxu1 %vm786_vm1, %v534_v11  ;;  %v544_v23 = vpack.c.bf16 %v210_v21, %v208_v20  ;;  %v209_v25 = vld [vmem:[%s784_s18 + $0x70] sm:$0xff]  ;;  %v212_v26 = vld [vmem:[%s784_s18 + $0x88] sm:$0xff]  ;;  %v214_v27 = vld [vmem:[%s784_s18 + $0x98] sm:$0xff] }
  0x22   : > { %v547_v28 = vpack.c.bf16 %v209_v25, %v207_v24  ;;  %v549_v29 = vpack.c.bf16 %v214_v27, %v212_v26  ;;  %v211_v30 = vld [vmem:[%s784_s18 + $0x80] sm:$0xff]  ;;  %v213_v31 = vld [vmem:[%s784_s18 + $0x90] sm:$0xff]  ;;  %v216_v32 = vld [vmem:[%s784_s18 + $0xa8] sm:$0xff] }
  0x23   : > { %v218_v33 = vld [vmem:[%s784_s18 + $0xb8] sm:$0xff]  ;;  %v552_v34 = vpack.c.bf16 %v213_v31, %v211_v30  ;;  %v215_v36 = vld [vmem:[%s784_s18 + $0xa0] sm:$0xff]  ;;  %v217_v37 = vld [vmem:[%s784_s18 + $0xb0] sm:$0xff] }
  0x24   : > { %v554_v35 = vpack.c.bf16 %v218_v33, %v216_v32  ;;  %v220_v38 = vld [vmem:[%s784_s18 + $0xc8] sm:$0xff]  ;;  %v222_v39 = vld [vmem:[%s784_s18 + $0xd8] sm:$0xff]  ;;  %v557_v40 = vpack.c.bf16 %v217_v37, %v215_v36  ;;  %v219_v42 = vld [vmem:[%s784_s18 + $0xc0] sm:$0xff] }
  0x25   : > { %v559_v41 = vpack.c.bf16 %v222_v39, %v220_v38  ;;  %v221_v43 = vld [vmem:[%s784_s18 + $0xd0] sm:$0xff]  ;;  %v224_v44 = vld [vmem:[%s784_s18 + $0xe8] sm:$0xff]  ;;  %v226_v45 = vld [vmem:[%s784_s18 + $0xf8] sm:$0xff] }
  0x26   : > { %v562_v46 = vpack.c.bf16 %v221_v43, %v219_v42  ;;  %v564_v47 = vpack.c.bf16 %v226_v45, %v224_v44  ;;  %v223_v48 = vld [vmem:[%s784_s18 + $0xe0] sm:$0xff]  ;;  %v225_v49 = vld [vmem:[%s784_s18 + $0xf0] sm:$0xff] }
  0x27   : > { %v567_v50 = vpack.c.bf16 %v225_v49, %v223_v48 }
  0x28   : > { %538 = vmatpush1.bf16.xpose.msra.mxu0 %v537_v16  ;;  %578 = vmatpush1.bf16.xpose.msra.mxu1 %v537_v16 }
  0x29   : > { %541 = vmatprep.subr.msk.bf16.mxu0 %vm786_vm1, %v539_v17  ;;  %571 = vmatprep.subr.msk.bf16.mxu1 %vm786_vm1, %v539_v17 }
  0x30   : > { %543 = vmatpush1.bf16.xpose.msra.mxu0 %v542_v22  ;;  %579 = vmatpush1.bf16.xpose.msra.mxu1 %v542_v22 }
  0x31   : > { %546 = vmatprep.subr.msk.bf16.mxu0 %vm786_vm1, %v544_v23  ;;  %572 = vmatprep.subr.msk.bf16.mxu1 %vm786_vm1, %v544_v23 }
  0x38   : > { %548 = vmatpush1.bf16.xpose.msra.mxu0 %v547_v28  ;;  %580 = vmatpush1.bf16.xpose.msra.mxu1 %v547_v28 }
  0x39   : > { %551 = vmatprep.subr.msk.bf16.mxu0 %vm786_vm1, %v549_v29  ;;  %573 = vmatprep.subr.msk.bf16.mxu1 %vm786_vm1, %v549_v29 }
  0x40   : > { %553 = vmatpush1.bf16.xpose.msra.mxu0 %v552_v34  ;;  %581 = vmatpush1.bf16.xpose.msra.mxu1 %v552_v34 }
  0x41   : > { %556 = vmatprep.subr.msk.bf16.mxu0 %vm786_vm1, %v554_v35  ;;  %574 = vmatprep.subr.msk.bf16.mxu1 %vm786_vm1, %v554_v35 }
  0x48   : > { %558 = vmatpush1.bf16.xpose.msra.mxu0 %v557_v40  ;;  %582 = vmatpush1.bf16.xpose.msra.mxu1 %v557_v40 }
  0x49   : > { %561 = vmatprep.subr.msk.bf16.mxu0 %vm786_vm1, %v559_v41  ;;  %575 = vmatprep.subr.msk.bf16.mxu1 %vm786_vm1, %v559_v41 }
  0x50   : > { %563 = vmatpush1.bf16.xpose.msra.mxu0 %v562_v46  ;;  %583 = vmatpush1.bf16.xpose.msra.mxu1 %v562_v46 }
  0x51   : > { %566 = vmatprep.subr.msk.bf16.mxu0 %vm786_vm1, %v564_v47  ;;  %576 = vmatprep.subr.msk.bf16.mxu1 %vm786_vm1, %v564_v47 }
  0x58   : > { %568 = vmatpush1.bf16.xpose.msra.mxu0 %v567_v50  ;;  %584 = vmatpush1.bf16.xpose.msra.mxu1 %v567_v50 }
  0x5f   : > { %347 = vmatmul.mubr.f32.vlgmr.msra.gmra.mrb[0].mxu0 %v191_v51  ;;  %352 = vmatmul.mubr.f32.vlgmr.msra.gmra.mrb[0].mxu1 %v193_v52 }
 0x12f   : > { %367 = sbr.rel (!%p758_p5) target bundleno = 318 (0x13e), region = 32 }
 0x132   : > { %v348_v53 = vpop.f32.mrb[0].mxu0  ;;  %v353_v54 = vpop.f32.mrb[0].mxu1 }
 0x133   : > { %v357_v55 = vmul.f32 0.0051020407, %v348_v53  ;;  %v358_v56 = vmul.f32 0.0051020407, %v353_v54  ;;  %v350_v57 = vpop.f32.mrb[1].mxu0  ;;  %v355_v58 = vpop.f32.mrb[1].mxu1 }
 0x135   : > { %359 = vst [vmem:[%s174_s22] sm:$0xff] %v357_v55  ;;  %360 = vst [vmem:[%s174_s22 + $0x8] sm:$0xf] %v358_v56 }
 0x13c   : > { %v401_v59 = vld [vmem:[%s174_s22] sm:$0xff]  ;;  %v403_v60 = vld [vmem:[%s174_s22 + $0x8] sm:$0xff] }
 0x13d   : > { %402 = vst [vmem:[%s371_s28] sm:$0xff] %v401_v59  ;;  %404 = vst [vmem:[%s371_s28 + $0x10] sm:$0xff] %v403_v60 }
 0x13e PF: > { %s12_s15 = sadd.s32 1, %s695_s15   ;;  %s891_s9 = smov %s675_s10 }
 0x13f   : > { %p9_p11 = scmp.ge.s32.totalorder %s12_s15, 6   ;;  %s892_s10 = smov %s769_s24 }
 0x140   : > { %s893_s11 = smov %s687_s13  ;;  %s894_s12 = smov %s691_s14 }
 0x141   : > { %s895_s13 = smov %s898_s16  ;;  %s896_s14 = smov %s902_s17 }
 0x142   :  { %11 = sbr.rel (!%p9_p11) target bundleno = 4 (0x4), region = 99 }

</bundles_post_ra>
